<compile_context>
chip_gen: v5e
topology: v5e:2x2
jax: 0.10.0
libtpu: 0.0.40
codegen_flags: <defaults>
</compile_context>

<pallas_src>
import functools
import math

import jax
import jax.numpy as jnp
from jax.experimental import pallas as pl
from jax.experimental.pallas import tpu as pltpu


def _round_up(n, m):
    return ((n + m - 1) // m) * m


def _pick_tile_t(T, d_model, max_block_bytes=2 * 1024 * 1024):
    """Largest multiple-of-8 row tile whose (tile_t, d_model) f32 block <= max_block_bytes."""
    t_pad = _round_up(T, 8)
    cap = max(8, ((max_block_bytes // (4 * d_model)) // 8) * 8)
    return min(t_pad, cap)


# ----------------------------------------------------------------------------
# Pallas kernel: fused  y = x * xscale + pe
# ----------------------------------------------------------------------------
def _posenc_kernel(x_ref, pe_ref, o_ref, *, xscale):
    # x_ref / o_ref: (tile_t, d_model)  (leading batch dim squeezed by BlockSpec)
    # pe_ref:        (tile_t, d_model)
    o_ref[...] = (x_ref[...] * xscale + pe_ref[...]).astype(o_ref.dtype)


def positional_encoding(x, pe, *, d_model=None, dropout_rate=0.0):
    """x: (B, T, D) f32; pe: (max_len, D) f32 buffer.  Returns x*sqrt(D) + pe[:T]."""
    B, T, D = x.shape
    if d_model is None:
        d_model = D
    assert D == d_model, "last dim of x must equal d_model"
    assert pe.shape[0] >= T and pe.shape[1] == D, "pe buffer too small"
    xscale = math.sqrt(d_model)

    tile_t = _pick_tile_t(T, D)
    nt = pl.cdiv(T, tile_t)

    flops = 2 * B * T * D                       # one mul + one add per element
    bytes_accessed = 4 * (2 * B * T * D + T * D)

    y = pl.pallas_call(
        functools.partial(_posenc_kernel, xscale=xscale),
        out_shape=jax.ShapeDtypeStruct((B, T, D), x.dtype),
        grid=(nt, B),   # batch innermost -> PE block DMA skipped across batch
        in_specs=[
            pl.BlockSpec((None, tile_t, D), lambda t, b: (b, t, 0)),  # x slab
            pl.BlockSpec((tile_t, D), lambda t, b: (t, 0)),           # pe slab
        ],
        out_specs=pl.BlockSpec((None, tile_t, D), lambda t, b: (b, t, 0)),
        compiler_params=pltpu.CompilerParams(
            dimension_semantics=("parallel", "parallel")),
        cost_estimate=pl.CostEstimate(flops=flops, transcendentals=0,
                                      bytes_accessed=bytes_accessed),
    )(x, pe[:T])
    # TODO(synk): torch.nn.Dropout after the add is identity in eval mode / p=0 and is omitted.
    del dropout_rate
    return y


# ----------------------------------------------------------------------------
# PE buffer construction (host, once) — mirrors torch extend_pe exactly.
# ----------------------------------------------------------------------------
def make_pe(max_len, d_model, reverse=False):
    if reverse:
        position = jnp.arange(max_len - 1, -1, -1.0, dtype=jnp.float32)[:, None]
    else:
        position = jnp.arange(0, max_len, dtype=jnp.float32)[:, None]
    div_term = jnp.exp(jnp.arange(0, d_model, 2, dtype=jnp.float32)
                       * -(math.log(10000.0) / d_model))
    ang = position * div_term
    pe = jnp.zeros((max_len, d_model), jnp.float32)
    pe = pe.at[:, 0::2].set(jnp.sin(ang))
    pe = pe.at[:, 1::2].set(jnp.cos(ang))
    return pe


if __name__ == "__main__":
    d_model = 256
    max_len = 512
    pe = make_pe(max_len, d_model)

    fwd = jax.jit(functools.partial(positional_encoding, pe=pe, d_model=d_model))

    key = jax.random.PRNGKey(0)
    ok = True
    # One tile-aligned sequence length and one ragged (non-multiple-of-8) length.
    for (B, T) in [(2, 96), (3, 100)]:
        key, sub = jax.random.split(key)
        x = jax.random.normal(sub, (B, T, d_model), jnp.float32)
        y = fwd(x)
        jax.block_until_ready(y)
        y_ref = x * math.sqrt(d_model) + pe[None, :T, :]
        ok &= (y.shape == (B, T, d_model))
        ok &= bool(jnp.allclose(y, y_ref, rtol=1e-6, atol=1e-6))
    assert ok, "Pallas PositionalEncoding mismatch vs reference"
    print("KERNEL_OK")
</pallas_src>

<mosaic_0001>
module attributes {stable_mosaic.version = 11 : i64} {
  func.func @_posenc_kernel(%arg0: i32, %arg1: i32, %arg2: memref<1x96x256xf32, #tpu.memory_space<vmem>>, %arg3: memref<96x256xf32, #tpu.memory_space<vmem>>, %arg4: memref<1x96x256xf32, #tpu.memory_space<vmem>>) attributes {dimension_semantics = [#tpu.dimension_semantics<parallel>, #tpu.dimension_semantics<parallel>], iteration_bounds = array<i64: 1, 2>, scalar_prefetch = 0 : i64, scratch_operands = 0 : i64, tpu.core_type = #tpu.core_type<tc>, window_params = [{transform_indices = @transform_0, window_bounds = array<i64: 1, 96, 256>}, {transform_indices = @transform_1, window_bounds = array<i64: 96, 256>}, {transform_indices = @transform_2, window_bounds = array<i64: 1, 96, 256>}]} {
    %c0 = arith.constant 0 : index
    %c0_0 = arith.constant 0 : index
    %c0_1 = arith.constant 0 : index
    %0 = vector.load %arg2[%c0, %c0_0, %c0_1] : memref<1x96x256xf32, #tpu.memory_space<vmem>>, vector<1x96x256xf32>
    %1 = vector.shape_cast %0 : vector<1x96x256xf32> to vector<96x256xf32>
    %cst = arith.constant 1.600000e+01 : f32
    %2 = vector.broadcast %cst : f32 to vector<96x256xf32>
    %3 = arith.mulf %1, %2 : vector<96x256xf32>
    %c0_2 = arith.constant 0 : index
    %c0_3 = arith.constant 0 : index
    %4 = vector.load %arg3[%c0_2, %c0_3] : memref<96x256xf32, #tpu.memory_space<vmem>>, vector<96x256xf32>
    %5 = arith.addf %3, %4 : vector<96x256xf32>
    %c0_4 = arith.constant 0 : index
    %c0_5 = arith.constant 0 : index
    %c0_6 = arith.constant 0 : index
    %6 = vector.load %arg4[%c0_4, %c0_5, %c0_6] : memref<1x96x256xf32, #tpu.memory_space<vmem>>, vector<1x96x256xf32>
    %7 = vector.shape_cast %6 : vector<1x96x256xf32> to vector<96x256xf32>
    %8 = vector.shape_cast %5 : vector<96x256xf32> to vector<1x96x256xf32>
    tpu.vector_store %arg4[%c0_4, %c0_5, %c0_6], %8 {strides = array<i32>} : memref<1x96x256xf32, #tpu.memory_space<vmem>>, vector<1x96x256xf32>,
    return
  }
  func.func @transform_0(%arg0: i32, %arg1: i32) -> (i32, i32, i32) {
    %c0_i32 = arith.constant 0 : i32
    %c0_i32_0 = arith.constant 0 : i32
    return %arg1, %arg0, %c0_i32 : i32, i32, i32
  }
  func.func @transform_1(%arg0: i32, %arg1: i32) -> (i32, i32) {
    %c0_i32 = arith.constant 0 : i32
    %c0_i32_0 = arith.constant 0 : i32
    return %arg0, %c0_i32 : i32, i32
  }
  func.func @transform_2(%arg0: i32, %arg1: i32) -> (i32, i32, i32) {
    %c0_i32 = arith.constant 0 : i32
    %c0_i32_0 = arith.constant 0 : i32
    return %arg1, %arg0, %c0_i32 : i32, i32, i32
  }
}

</mosaic_0001>

<bundles_post_ra>
// kernel: positional_encoding.1
= control target key start
LH: loop header
LB: loop body
LE: loop exit
PB: predicated region body
PF: predicated region fallthrough
CT: control target
= control target key end

     0   :  { %7 = vsyncpa [#allocation3], 0  ;;  %s916_s0 = inlined_call_operand.hbm [shape: f32[2,96,256], index: 0, kind: input, shape index: {}]   ;;  %s917_s1 = inlined_call_operand.hbm [shape: f32[96,256], index: 1, kind: input, shape index: {}]   ;;  %s918_s2 = inlined_call_operand.hbm [shape: f32[2,96,256], index: 2, kind: output, shape index: {}]  }
   0x1   :  { %9 = vsyncpa [#allocation3 + $0x1], 0 }
   0x2   :  { %10 = vsyncpa [#allocation6], 0 }
   0x3   :  { %11 = vsyncpa [#allocation4], 0 }
   0x4   :  { %13 = vsyncpa [#allocation4 + $0x1], 0  ;;  %s710_s9 = smov 0   ;;  %s712_s10 = smov 0  }
   0x5   :  { %s714_s11 = smov 0   ;;  %s716_s12 = smov 0  }
   0x6   :  { %s718_s13 = smov 0   ;;  %s720_s14 = smov 0  }
   0x7 LB: > { %s450_s15 = sadd.s32 4294967295, %s688_s14   ;;  %s451_s16 = sadd.s32 4294967294, %s688_s14   ;;  %s688_s14 = sphi %s720_s14, %s19_s14   ;;  %s684_s13 = sphi %s718_s13, %s929_s13   ;;  %s680_s12 = sphi %s716_s12, %s928_s12   ;;  %s676_s11 = sphi %s714_s11, %s927_s11   ;;  %s672_s10 = sphi %s712_s10, %s926_s10   ;;  %s668_s9 = sphi %s710_s9, %s925_s9  }
   0x8   : > { %p53_p0 = scmp.ne.s32.totalorder %s672_s10, %s668_s9  ;;  %p744_p1 = scmp.eq.s32.totalorder %s450_s15, 0 }
   0x9   : > { %p748_p2 = scmp.eq.s32.totalorder %s450_s15, 1  ;;  %p111_p3 = scmp.eq.s32.totalorder %s451_s16, 1 }
   0xa   : > { %p754_p4 = por %p744_p1, %p53_p0  ;;  %p452_p5 = scmp.ge.s32.totalorder %s688_s14, 1 }
   0xb   : > { %p759_p6 = por %p111_p3, %p53_p0  ;;  %p118_p7 = scmp.lt.s32.totalorder %s688_s14, 3 }
   0xc   : > { %s133_s23 = sshll.u32 %s917_s1, 4  ;;  %s690_s25 = smov [#allocation5]   ;;  %s134_s23 = int_to_ptr.hbm [resolvable:$true] %s133_s23 }
   0xd   : > { %p767_p8 = pnand %p452_p5, %p118_p7  ;;  %s135_s26 = sshll.u32 %s690_s25, 4  ;;  %s136_s26 = int_to_ptr.vmem [resolvable:$true] %s135_s26 }
   0xe   : > { %p454_p11 = scmp.ge.s32.totalorder %s688_s14, 2  ;;  %s691_s27 = smov 256  }
   0xf   : > { %p473_p9 = pneg %p767_p8  ;;  %s692_s28 = smov 16  }
  0x10   : > { %s28_s29 = sadd.s32 1, %s684_s13  ;;  %s40_s30 = sadd.s32 1, %s676_s11 }
  0x11   : > { %p474_p10 = pnand %p473_p9, %p744_p1  ;;  %p29_p12 = scmp.ge.s32.totalorder %s28_s29, 2 }
  0x12   : > { %p47_p13 = scmp.ne.s32.totalorder %s676_s11, %s672_s10  ;;  %p48_p0 = scmp.eq.s32.totalorder %s688_s14, 0 }
  0x13   : > { %476 = dma.hbm_to_vmem [thread:$0]  (!%p474_p10), %s134_s23, 3072, %s136_s26, [#allocation6], %s691_s27, %s691_s27, %s692_s28  }
  0x14   : > { %s931_s29 = smov (%p29_p12, %s28_s29), 0  ;;  %p49_p3 = por %p48_p0, %p47_p13 }
  0x15   : > { %p788_p5 = por %p748_p2, %p47_p13  ;;  %s35_s4 = ssub.s32 %s684_s13, %s931_s29 }
  0x16   : > { %p486_p7 = scmp.lt.s32.totalorder %s688_s14, 2  ;;  %p38_p9 = scmp.eq.s32.totalorder %s35_s4, 0 }
  0x17   : > { %s149_s5 = sand.u32 1, %s676_s11   ;;  %s462_s8 = smul.u32 192, %s684_s13 }
  0x18   : > { %s461_s6 = smul.u32 192, %s149_s5  ;;  %p478_p10 = pnand %p486_p7, %p49_p3 }
  0x19   : > { %s797_s7 = scalar_select %p38_p9, %s676_s11, %s40_s30  }
  0x1a   : > { %s153_s15 = scalar_lea.vmem [#allocation2], %s461_s6  ;;  %s161_s23 = scalar_lea.hbm %s916_s0, %s462_s8 }
  0x1b   : > { %s164_s16 = sshll.u32 %s153_s15, 4  ;;  %s162_s18 = sshll.u32 %s161_s23, 4  ;;  %s165_s16 = int_to_ptr.vmem [resolvable:$true] %s164_s16  ;;  %s163_s18 = int_to_ptr.hbm [resolvable:$true] %s162_s18 }
  0x1c   : > { %s150_s25 = scalar_lea.sflag [#allocation3], %s149_s5  ;;  %176 = sbr.rel (%p767_p8) target bundleno = 69 (0x45), region = 28 }
  0x1d   : > { %480 = dma.hbm_to_vmem [thread:$0]  (!%p478_p10), %s163_s18, 3072, %s165_s16, %s150_s25, %s691_s27, %s691_s27, %s692_s28  }
  0x1e   : > { %s809_s26 = sand.u32 (!%p767_p8), 1, %s672_s10  }
  0x1f   : > { %s463_s30 = smul.u32 (!%p767_p8), 192, %s809_s26  ;;  %s179_s4 = scalar_lea.sflag (!%p767_p8), [#allocation3], %s809_s26 }
  0x21   : > { %s815_s6 = scalar_lea.vmem [#allocation2], %s463_s30 }
  0x22   : > { %655 = dma.done.wait (%p754_p4), %s179_s4, 3072  }
  0x23   : > { %657 = vsyncadd (%p754_p4), %s179_s4, 4294964224 }
  0x24   : > { %659 = dma.done.wait (%p744_p1), [#allocation6], 3072  }
  0x25   : > { %661 = vsyncadd (%p744_p1), [#allocation6], 4294964224  ;;  %v212_v0 = vld [vmem:[%s815_s6] sm:$0xff]  ;;  %v213_v2 = vld [vmem:[%s815_s6 + $0x8] sm:$0xff]  ;;  %s835_s17 = scalar_lea.vmem [#allocation7], %s463_s30  ;;  %s464_s19 = smul.u32 192, %s680_s12 }
  0x26   : > { %v260_v1 = vld [vmem:[#allocation5] sm:$0xff]  ;;  %v236_v3 = vmul.f32 16.0, %v212_v0  ;;  %v237_v4 = vmul.f32 16.0, %v213_v2  ;;  %v261_v5 = vld [vmem:[#allocation5 + $0x8] sm:$0xff]  ;;  %v214_v6 = vld [vmem:[%s815_s6 + $0x10] sm:$0xff]  ;;  %s348_s28 = sshll.u32 %s835_s17, 4  ;;  %s349_s28 = int_to_ptr.vmem [resolvable:$true] %s348_s28 }
  0x27   : > { %v262_v7 = vld [vmem:[#allocation5 + $0x10] sm:$0xff]  ;;  %v238_v8 = vmul.f32 16.0, %v214_v6  ;;  %v215_v9 = vld [vmem:[%s815_s6 + $0x18] sm:$0xff]  ;;  %v216_v11 = vld [vmem:[%s815_s6 + $0x20] sm:$0xff]  ;;  %s347_s27 = scalar_lea.hbm %s918_s2, %s464_s19  ;;  %s333_s8 = scalar_lea.sflag [#allocation4], %s809_s26 }
  0x28   : > { %v263_v10 = vld [vmem:[#allocation5 + $0x18] sm:$0xff]  ;;  %v284_v12 = vadd.f32 %v260_v1, %v236_v3  ;;  %v285_v13 = vadd.f32 %v261_v5, %v237_v4  ;;  %v239_v14 = vmul.f32 16.0, %v215_v9  ;;  %v240_v15 = vmul.f32 16.0, %v216_v11  ;;  %v264_v16 = vld [vmem:[#allocation5 + $0x20] sm:$0xff]  ;;  %v217_v17 = vld [vmem:[%s815_s6 + $0x28] sm:$0xff]  ;;  %s350_s5 = sshll.u32 %s347_s27, 4  ;;  %s351_s5 = int_to_ptr.hbm [resolvable:$true] %s350_s5 }
  0x29   : > { %v265_v18 = vld [vmem:[#allocation5 + $0x28] sm:$0xff]  ;;  %v286_v19 = vadd.f32 %v262_v7, %v238_v8  ;;  %v241_v20 = vmul.f32 16.0, %v217_v17  ;;  %v218_v21 = vld [vmem:[%s815_s6 + $0x30] sm:$0xff]  ;;  %v219_v23 = vld [vmem:[%s815_s6 + $0x38] sm:$0xff]  ;;  %s616_s15 = sshra.s32 %s351_s5, 4  ;;  %s622_s23 = scalar_lea.hbm %s918_s2, 384  ;;  %s617_s15 = int_to_ptr.hbm [resolvable:$true] %s616_s15 }
  0x2a   : > { %v266_v22 = vld [vmem:[#allocation5 + $0x30] sm:$0xff]  ;;  %308 = vst [vmem:[%s835_s17] sm:$0xff] %v284_v12  ;;  %v287_v24 = vadd.f32 %v263_v10, %v239_v14  ;;  %v288_v25 = vadd.f32 %v264_v16, %v240_v15  ;;  %v242_v26 = vmul.f32 16.0, %v218_v21  ;;  %v243_v27 = vmul.f32 16.0, %v219_v23  ;;  %v267_v28 = vld [vmem:[#allocation5 + $0x38] sm:$0xff]  ;;  %v220_v29 = vld [vmem:[%s815_s6 + $0x40] sm:$0xff]  ;;  %s618_s16 = scalar_lea.hbm %s617_s15, 192  ;;  %p623_p8 = scmp.lt.s32.totalorder %s617_s15, %s918_s2 }
  0x2b   : > { %309 = vst [vmem:[%s835_s17 + $0x8] sm:$0xff] %v285_v13  ;;  %v289_v30 = vadd.f32 %v265_v18, %v241_v20  ;;  %v244_v31 = vmul.f32 16.0, %v220_v29  ;;  %v268_v32 = vld [vmem:[#allocation5 + $0x40] sm:$0xff]  ;;  %v221_v33 = vld [vmem:[%s815_s6 + $0x48] sm:$0xff]  ;;  %v222_v34 = vld [vmem:[%s815_s6 + $0x50] sm:$0xff]  ;;  %p619_p1 = scmp.ne.s32.totalorder %s617_s15, %s618_s16  ;;  %p624_p12 = scmp.lt.s32.totalorder %s622_s23, %s618_s16 }
  0x2c   : > { %310 = vst [vmem:[%s835_s17 + $0x10] sm:$0xff] %v286_v19  ;;  %v290_v35 = vadd.f32 %v266_v22, %v242_v26  ;;  %v245_v36 = vmul.f32 16.0, %v221_v33  ;;  %v269_v37 = vld [vmem:[#allocation5 + $0x48] sm:$0xff]  ;;  %v246_v38 = vmul.f32 16.0, %v222_v34  ;;  %v223_v39 = vld [vmem:[%s815_s6 + $0x58] sm:$0xff]  ;;  %v291_v40 = vadd.f32 %v267_v28, %v243_v27  ;;  %v270_v41 = vld [vmem:[#allocation5 + $0x50] sm:$0xff] }
  0x2d   : > { %311 = vst [vmem:[%s835_s17 + $0x18] sm:$0xff] %v287_v24  ;;  %v247_v42 = vmul.f32 16.0, %v223_v39  ;;  %v224_v43 = vld [vmem:[%s815_s6 + $0x60] sm:$0xff]  ;;  %v225_v44 = vld [vmem:[%s815_s6 + $0x68] sm:$0xff]  ;;  %v292_v45 = vadd.f32 %v268_v32, %v244_v31  ;;  %v271_v46 = vld [vmem:[#allocation5 + $0x58] sm:$0xff]  ;;  %p620_p2 = pnand %p619_p1, %p788_p5  ;;  %p625_p13 = por %p624_p12, %p623_p8 }
  0x2e   : > { %312 = vst [vmem:[%s835_s17 + $0x20] sm:$0xff] %v288_v25  ;;  %v248_v47 = vmul.f32 16.0, %v224_v43  ;;  %v226_v48 = vld [vmem:[%s815_s6 + $0x70] sm:$0xff]  ;;  %v293_v49 = vadd.f32 %v269_v37, %v245_v36  ;;  %v272_v50 = vld [vmem:[#allocation5 + $0x60] sm:$0xff]  ;;  %v249_v51 = vmul.f32 16.0, %v225_v44  ;;  %v227_v52 = vld [vmem:[%s815_s6 + $0x78] sm:$0xff]  ;;  %v294_v54 = vadd.f32 %v270_v41, %v246_v38 }
  0x2f   : > { %313 = vst [vmem:[%s835_s17 + $0x28] sm:$0xff] %v289_v30  ;;  %v228_v53 = vld [vmem:[%s815_s6 + $0x80] sm:$0xff]  ;;  %v273_v55 = vld [vmem:[#allocation5 + $0x68] sm:$0xff]  ;;  %v250_v56 = vmul.f32 16.0, %v226_v48  ;;  %v295_v58 = vadd.f32 %v271_v46, %v247_v42  ;;  %v274_v59 = vld [vmem:[#allocation5 + $0x70] sm:$0xff]  ;;  %v251_v60 = vmul.f32 16.0, %v227_v52  ;;  %p621_p4 = pneg %p620_p2 }
  0x30   : > { %314 = vst [vmem:[%s835_s17 + $0x30] sm:$0xff] %v290_v35  ;;  %v229_v57 = vld [vmem:[%s815_s6 + $0x88] sm:$0xff]  ;;  %v230_v61 = vld [vmem:[%s815_s6 + $0x90] sm:$0xff]  ;;  %v296_v62 = vadd.f32 %v272_v50, %v248_v47  ;;  %v275_v63 = vld [vmem:[#allocation5 + $0x78] sm:$0xff]  ;;  %v252_v0 = vmul.f32 16.0, %v228_v53  ;;  %v297_v2 = vadd.f32 %v273_v55, %v249_v51 }
  0x31   : > { %315 = vst [vmem:[%s835_s17 + $0x38] sm:$0xff] %v291_v40  ;;  %v231_v1 = vld [vmem:[%s815_s6 + $0x98] sm:$0xff]  ;;  %v276_v3 = vld [vmem:[#allocation5 + $0x80] sm:$0xff]  ;;  %v253_v4 = vmul.f32 16.0, %v229_v57  ;;  %v298_v6 = vadd.f32 %v274_v59, %v250_v56  ;;  %v277_v7 = vld [vmem:[#allocation5 + $0x88] sm:$0xff]  ;;  %v254_v8 = vmul.f32 16.0, %v230_v61  ;;  %v299_v10 = vadd.f32 %v275_v63, %v251_v60  ;;  %p626_p0 = pnand %p625_p13, %p621_p4 }
  0x32   : > { %316 = vst [vmem:[%s835_s17 + $0x40] sm:$0xff] %v292_v45  ;;  %v232_v5 = vld [vmem:[%s815_s6 + $0xa0] sm:$0xff]  ;;  %v233_v9 = vld [vmem:[%s815_s6 + $0xa8] sm:$0xff]  ;;  %v278_v11 = vld [vmem:[#allocation5 + $0x90] sm:$0xff]  ;;  %v255_v12 = vmul.f32 16.0, %v231_v1  ;;  %v300_v14 = vadd.f32 %v276_v3, %v252_v0 }
  0x33   : > { %317 = vst [vmem:[%s835_s17 + $0x48] sm:$0xff] %v293_v49  ;;  %v234_v13 = vld [vmem:[%s815_s6 + $0xb0] sm:$0xff]  ;;  %v279_v15 = vld [vmem:[#allocation5 + $0x98] sm:$0xff]  ;;  %v256_v16 = vmul.f32 16.0, %v232_v5  ;;  %v301_v18 = vadd.f32 %v277_v7, %v253_v4  ;;  %v280_v19 = vld [vmem:[#allocation5 + $0xa0] sm:$0xff]  ;;  %v257_v20 = vmul.f32 16.0, %v233_v9  ;;  %v302_v21 = vadd.f32 %v278_v11, %v254_v8 }
  0x34   : > { %318 = vst [vmem:[%s835_s17 + $0x50] sm:$0xff] %v294_v54  ;;  %v235_v17 = vld [vmem:[%s815_s6 + $0xb8] sm:$0xff]  ;;  %v281_v22 = vld [vmem:[#allocation5 + $0xa8] sm:$0xff]  ;;  %v258_v23 = vmul.f32 16.0, %v234_v13  ;;  %v303_v24 = vadd.f32 %v279_v15, %v255_v12  ;;  %v282_v25 = vld [vmem:[#allocation5 + $0xb0] sm:$0xff] }
  0x35   : > { %319 = vst [vmem:[%s835_s17 + $0x58] sm:$0xff] %v295_v58  ;;  %v259_v26 = vmul.f32 16.0, %v235_v17  ;;  %v304_v27 = vadd.f32 %v280_v19, %v256_v16  ;;  %v283_v28 = vld [vmem:[#allocation5 + $0xb8] sm:$0xff]  ;;  %v305_v29 = vadd.f32 %v281_v22, %v257_v20 }
  0x36   : > { %320 = vst [vmem:[%s835_s17 + $0x60] sm:$0xff] %v296_v62  ;;  %v306_v30 = vadd.f32 %v282_v25, %v258_v23 }
  0x37   : > { %321 = vst [vmem:[%s835_s17 + $0x68] sm:$0xff] %v297_v2  ;;  %v307_v31 = vadd.f32 %v283_v28, %v259_v26 }
  0x38   : > { %322 = vst [vmem:[%s835_s17 + $0x70] sm:$0xff] %v298_v6 }
  0x39   : > { %323 = vst [vmem:[%s835_s17 + $0x78] sm:$0xff] %v299_v10 }
  0x3a   : > { %324 = vst [vmem:[%s835_s17 + $0x80] sm:$0xff] %v300_v14 }
  0x3b   : > { %325 = vst [vmem:[%s835_s17 + $0x88] sm:$0xff] %v301_v18 }
  0x3c   : > { %326 = vst [vmem:[%s835_s17 + $0x90] sm:$0xff] %v302_v21 }
  0x3d   : > { %327 = vst [vmem:[%s835_s17 + $0x98] sm:$0xff] %v303_v24 }
  0x3e   : > { %328 = vst [vmem:[%s835_s17 + $0xa0] sm:$0xff] %v304_v27 }
  0x3f   : > { %329 = vst [vmem:[%s835_s17 + $0xa8] sm:$0xff] %v305_v29 }
  0x40   : > { %330 = vst [vmem:[%s835_s17 + $0xb0] sm:$0xff] %v306_v30 }
  0x41   : > { %331 = vst [vmem:[%s835_s17 + $0xb8] sm:$0xff] %v307_v31 }
  0x42   : > { %629 = shalt.err (!%p626_p0)
}
  0x43   : > { %s693_s26 = smov 256   ;;  %s694_s30 = smov 16  }
  0x44   : > { %471 = dma.vmem_to_hbm [thread:$0]  (%p788_p5), %s349_s28, 3072, %s351_s5, %s333_s8, %s693_s26, %s693_s26, %s694_s30  }
  0x45 PF: > { %s365_s4 = sand.u32 1, %s668_s9   ;;  %p482_p3 = pnand %p454_p11, %p759_p6 }
  0x46   : > { %s366_s6 = scalar_lea.sflag [#allocation4], %s365_s4 }
  0x47   : > { %p483_p7 = pneg %p482_p3 }
  0x49   : > { %663 = dma.done.wait (%p483_p7), %s366_s6, 3072  }
  0x4a   : > { %665 = vsyncadd (%p483_p7), %s366_s6, 4294964224  ;;  %s19_s14 = sadd.s32 1, %s688_s14   ;;  %s925_s9 = smov %s672_s10 }
  0x4b   : > { %p16_p9 = scmp.ge.s32.totalorder %s19_s14, 4   ;;  %s926_s10 = smov %s676_s11 }
  0x4c   : > { %s927_s11 = smov %s797_s7  ;;  %s928_s12 = smov %s684_s13 }
  0x4d   : > { %s929_s13 = smov %s931_s29  ;;  %18 = sbr.rel (!%p16_p9) target bundleno = 7 (0x7), region = 78 }
  0x52   :  { %372 = vsyncpa [#allocation3], 1 }
  0x53   :  { %374 = vsyncpa [#allocation3 + $0x1], 1 }
  0x54   :  { %375 = vsyncpa [#allocation6], 1 }
  0x55   :  { %376 = vsyncpa [#allocation4], 1 }
  0x56   :  { %378 = vsyncpa [#allocation4 + $0x1], 1 }

</bundles_post_ra>
